<compile_context>
chip_gen: v7x
topology: tpu7x:2x2x1
jax: 0.10.0
libtpu: 0.0.40
codegen_flags: <defaults>
</compile_context>

<pallas_src>
import functools

import jax
import jax.numpy as jnp
from jax.experimental import pallas as pl
from jax.experimental.pallas import tpu as pltpu


def _bam_distill_kernel(*refs, mode, n_valid):
    # Ref layout (static mode):
    #   "soft" : logits, cols(label, tw),       soft, out
    #   "index": logits, cols(label, sidx, tw),       out
    #   "eval" : logits, cols(label,),                out
    if mode == "soft":
        logits_ref, cols_ref, soft_ref, out_ref = refs
    else:
        logits_ref, cols_ref, out_ref = refs

    pid = pl.program_id(0)

    logits = logits_ref[...].astype(jnp.float32)            # [T, C]
    t, c = logits.shape

    # Stable log-softmax pieces; log-probs themselves never materialized.
    m = jnp.max(logits, axis=-1, keepdims=True)
    shifted = logits - m                                     # [T, C]
    lse = jnp.log(jnp.sum(jnp.exp(shifted), axis=-1, keepdims=True))  # [T, 1]

    # Validity mask for the (possibly partial) last block.  Use where()
    # selection (NOT multiply) so NaN/Inf garbage in OOB rows cannot leak.
    row = pid * t + jax.lax.broadcasted_iota(jnp.int32, (t, 1), 0)
    valid = row < n_valid                                    # [T, 1] bool

    cls = jax.lax.broadcasted_iota(jnp.int32, (t, c), 1)     # [T, C]

    cols = cols_ref[...].astype(jnp.float32)                 # [T, k]
    label = cols[:, 0:1].astype(jnp.int32)                   # exact (ids << 2^24)

    # Hard CE: -log p[label] = lse - shifted[label]  (where-select, no one-hot)
    hard = lse - jnp.sum(jnp.where(cls == label, shifted, 0.0),
                         axis=-1, keepdims=True)
    hard = jnp.where(valid, hard, 0.0)                       # [T, 1]

    if mode == "soft":
        soft_d = soft_ref[...].astype(jnp.float32)           # [T, C]
        ssum = jnp.sum(soft_d, axis=-1, keepdims=True)       # don't assume normalized
        soft = ssum * lse - jnp.sum(soft_d * shifted, axis=-1, keepdims=True)
        soft = jnp.where(valid, soft, 0.0)
        tw = jnp.where(valid, cols[:, 1:2], 0.0)
    elif mode == "index":
        sidx = cols[:, 1:2].astype(jnp.int32)
        soft = lse - jnp.sum(jnp.where(cls == sidx, shifted, 0.0),
                             axis=-1, keepdims=True)
        soft = jnp.where(valid, soft, 0.0)
        tw = jnp.where(valid, cols[:, 2:3], 0.0)
    else:  # "eval"
        soft = None
        tw = None

    h_sum = jnp.sum(hard)
    if soft is not None:
        s_sum = jnp.sum(soft)
        htw_sum = jnp.sum(hard * tw)
        stw_sum = jnp.sum(soft * tw)
    else:
        s_sum = jnp.float32(0.0)
        htw_sum = jnp.float32(0.0)
        stw_sum = jnp.float32(0.0)

    # Lane-dense per-block partial sums:
    #   lane 0: sum(hard), lane 1: sum(soft), lane 2: sum(hard*tw),
    #   lane 3: sum(soft*tw), lanes 4..127: 0.
    lane = jax.lax.broadcasted_iota(jnp.int32, (1, 8, 128), 2)
    vec = jnp.where(lane == 0, h_sum,
          jnp.where(lane == 1, s_sum,
          jnp.where(lane == 2, htw_sum,
          jnp.where(lane == 3, stw_sum, jnp.float32(0.0)))))
    out_ref[...] = vec


def _device_budgets():
    # (total estimated VMEM footprint budget, vmem_limit_bytes)
    try:
        kind = jax.devices()[0].device_kind.lower()
    except Exception:  # pragma: no cover
        kind = ""
    if "v7" in kind or "7x" in kind:
        # v7x: only 64 MiB physical VMEM per TensorCore -- stay well under.
        return 24 * (1 << 20), 40 * (1 << 20)
    # v5e / v6e: 128 MiB physical VMEM, 16/32 MiB scoped defaults -> raise.
    return 40 * (1 << 20), 64 * (1 << 20)


def _pick_tile_n(n, c, row_itemsizes, col_bytes_per_row, n_f32_temps):
    """Pick TILE_N from the combined footprint of all streamed tiles."""
    budget, vmem_limit = _device_budgets()
    # Double-buffered input streams + f32 elementwise/reduction temporaries.
    stream_row = sum(row_itemsizes) * c + col_bytes_per_row
    per_row = 2 * stream_row + n_f32_temps * 4 * c
    t = budget // max(per_row, 1)
    # Sublane alignment keyed to the narrowest streamed row dtype.
    min_item = min(row_itemsizes)
    align = 8 if min_item >= 4 else (16 if min_item == 2 else 32)
    if t >= n:
        return int(n), vmem_limit
    t = max(align, (int(t) // align) * align)
    return int(t), vmem_limit
    # TODO(synk): for vocab-scale C, add a class-axis grid dimension with an
    # online (running max / lse) softmax accumulator instead of a full-C row.


def _run_bam_kernel(mode, logits, hard_label, soft_arr, task_weights,
                    *, tile_n=None):
    """Returns lane-dense partial sums reduced over blocks:
       [sum(hard), sum(soft), sum(hard*tw), sum(soft*tw)] (f32)."""
    n, c = logits.shape

    # Pack the narrow per-row operands into one f32 column array (one DMA
    # descriptor per block instead of three).  Class indices are exact in f32.
    cols_list = [hard_label.astype(jnp.float32).reshape(n, 1)]
    if mode == "index":
        cols_list.append(soft_arr.astype(jnp.float32).reshape(n, 1))
    if mode in ("soft", "index"):
        cols_list.append(task_weights.astype(jnp.float32).reshape(n, 1))
    cols = cols_list[0] if len(cols_list) == 1 else jnp.concatenate(cols_list, 1)
    k = cols.shape[1]

    row_itemsizes = [jnp.dtype(logits.dtype).itemsize]
    if mode == "soft":
        row_itemsizes.append(jnp.dtype(soft_arr.dtype).itemsize)
    n_f32_temps = 6 if mode == "soft" else 4

    auto_tile, vmem_limit = _pick_tile_n(n, c, row_itemsizes, 4 * k, n_f32_temps)
    if tile_n is None:
        tile_n = auto_tile
    tile_n = min(int(tile_n), n)
    if tile_n < n:
        tile_n = max(8, (tile_n // 8) * 8)        # sublane-aligned tiles

    num_blocks = pl.cdiv(n, tile_n)               # partial last block OK (no pad)

    row_spec = pl.BlockSpec((tile_n, c), lambda i: (i, 0))
    col_spec = pl.BlockSpec((tile_n, k), lambda i: (i, 0))

    args = [logits, cols]
    in_specs = [row_spec, col_spec]
    if mode == "soft":
        args.append(soft_arr)
        in_specs.append(pl.BlockSpec((tile_n, c), lambda i: (i, 0)))

    kernel = functools.partial(_bam_distill_kernel, mode=mode, n_valid=n)

    part = pl.pallas_call(
        kernel,
        grid=(num_blocks,),
        in_specs=in_specs,
        # Lane-dense per-block partials; blocks are independent -> "parallel"
        # lets v7x shard the grid across both TensorCores.
        out_specs=pl.BlockSpec((1, 8, 128), lambda i: (i, 0, 0)),
        out_shape=jax.ShapeDtypeStruct((num_blocks, 8, 128), jnp.float32),
        compiler_params=pltpu.CompilerParams(
            dimension_semantics=("parallel",),
            vmem_limit_bytes=int(vmem_limit)),
    )(*args)

    # Tiny cross-block reduction in XLA.
    sums = jnp.sum(part[:, 0, :], axis=0)         # [128]
    return sums[:4]


class BamDistillLoss:
    """JAX/Pallas port of the PyTorch BamDistillLoss module (forward pass)."""

    def __init__(self, anneal=None, **kwargs):
        self.anneal = anneal
        self.coeff = kwargs['coeff']
        self.temperature = kwargs['temperature']   # unused in forward, as in PyTorch
        self.label_type = kwargs['label_type']
        if self.anneal:
            self.inc_per_step = 1.0 / kwargs['total_step']
            self.coeff = -self.inc_per_step
        else:
            self.inc_per_step = 0.0

    def step(self):
        self.coeff += self.inc_per_step

    def __call__(self, logits, hard_label, **kwargs):
        running_mode = kwargs['running_mode']
        n = logits.shape[0]

        if running_mode != 'training':
            # Eval: hard CE only; no soft-distribution / task-weight bytes read.
            sums = _run_bam_kernel("eval", logits, hard_label, None, None)
            return sums[0] / n

        soft_labels = kwargs['soft_labels']
        task_weights = kwargs['task_weights']

        if self.label_type == 'soft':
            mode, soft_arr = "soft", soft_labels
        else:
            # 'hard': CE against argmax(teacher); only an index column is
            # streamed through the kernel (no dense one-hot through HBM).
            mode, soft_arr = "index", jnp.argmax(soft_labels, axis=-1)

        if not self.anneal:
            hard_w, soft_w = 1.0, self.coeff
        else:
            self.step()
            hard_w, soft_w = self.coeff, 1.0 - self.coeff

        sums = _run_bam_kernel(mode, logits, hard_label, soft_arr, task_weights)
        hard_mean = sums[0] / n
        soft_mean = sums[1] / n
        # Anneal weights applied here (XLA) -> kernel never recompiles on step.
        total = (hard_w * sums[2] + soft_w * sums[3]) / n
        return total, hard_mean, soft_mean, self.coeff


if __name__ == "__main__":
    key = jax.random.PRNGKey(0)
    k1, k2, k3, k4 = jax.random.split(key, 4)

    # --- small primary test: N=8, C=32, label_type='soft', training ---------
    N, C = 8, 32
    logits = jax.random.normal(k1, (N, C), jnp.float32)
    hard_label = jax.random.randint(k2, (N,), 0, C, jnp.int32)
    teacher_logits = jax.random.normal(k3, (N, C), jnp.float32)
    soft_labels = jax.nn.softmax(teacher_logits, axis=-1)
    task_weights = jax.random.uniform(k4, (N,), jnp.float32, 0.5, 1.5)

    loss_fn = BamDistillLoss(anneal=None, coeff=0.5, temperature=1.0,
                             label_type='soft')
    total, hard_m, soft_m, coeff = loss_fn(
        logits, hard_label, running_mode='training',
        soft_labels=soft_labels, task_weights=task_weights)
    jax.block_until_ready((total, hard_m, soft_m))

    logp = jax.nn.log_softmax(logits, axis=-1)
    hard_ref = -jnp.take_along_axis(logp, hard_label[:, None], axis=-1)[:, 0]
    soft_ref = jnp.sum(soft_labels * -logp, axis=-1)
    total_ref = jnp.mean((hard_ref + 0.5 * soft_ref) * task_weights)
    assert jnp.allclose(total, total_ref, atol=1e-5, rtol=1e-5)
    assert jnp.allclose(hard_m, jnp.mean(hard_ref), atol=1e-5, rtol=1e-5)
    assert jnp.allclose(soft_m, jnp.mean(soft_ref), atol=1e-5, rtol=1e-5)
    assert abs(coeff - 0.5) < 1e-12

    # --- label_type='hard' path (argmax index column, no dense one-hot) -----
    loss_fn_h = BamDistillLoss(anneal=None, coeff=0.3, temperature=1.0,
                               label_type='hard')
    total_h, hard_mh, soft_mh, _ = loss_fn_h(
        logits, hard_label, running_mode='training',
        soft_labels=soft_labels, task_weights=task_weights)
    jax.block_until_ready((total_h, hard_mh, soft_mh))
    s_idx = jnp.argmax(soft_labels, axis=-1)
    soft_ref_h = -jnp.take_along_axis(logp, s_idx[:, None], axis=-1)[:, 0]
    total_ref_h = jnp.mean((hard_ref + 0.3 * soft_ref_h) * task_weights)
    assert jnp.allclose(total_h, total_ref_h, atol=1e-5, rtol=1e-5)
    assert jnp.allclose(soft_mh, jnp.mean(soft_ref_h), atol=1e-5, rtol=1e-5)

    # --- eval path (hard CE only, no soft / tw bytes read) -------------------
    eval_loss = loss_fn(logits, hard_label, running_mode='eval')
    jax.block_until_ready(eval_loss)
    assert jnp.allclose(eval_loss, jnp.mean(hard_ref), atol=1e-5, rtol=1e-5)

    # --- ragged + partial-block path: N=20, forced TILE_N=8 (grid of 3, no
    #     wrapper-side padding) with a bf16 teacher stream on the wire --------
    N2 = 20
    kk = jax.random.split(jax.random.PRNGKey(1), 4)
    logits2 = jax.random.normal(kk[0], (N2, C), jnp.float32)
    hard2 = jax.random.randint(kk[1], (N2,), 0, C, jnp.int32)
    soft2 = jax.nn.softmax(jax.random.normal(kk[2], (N2, C), jnp.float32),
                           axis=-1).astype(jnp.bfloat16)
    tw2 = jax.random.uniform(kk[3], (N2,), jnp.float32, 0.5, 1.5)

    s2 = _run_bam_kernel("soft", logits2, hard2, soft2, tw2, tile_n=8)
    jax.block_until_ready(s2)
    total2 = (1.0 * s2[2] + 0.5 * s2[3]) / N2
    hard_m2 = s2[0] / N2
    soft_m2 = s2[1] / N2

    logp2 = jax.nn.log_softmax(logits2, axis=-1)
    hard_ref2 = -jnp.take_along_axis(logp2, hard2[:, None], axis=-1)[:, 0]
    soft_ref2 = jnp.sum(soft2.astype(jnp.float32) * -logp2, axis=-1)
    total_ref2 = jnp.mean((hard_ref2 + 0.5 * soft_ref2) * tw2)
    assert jnp.allclose(total2, total_ref2, atol=1e-5, rtol=1e-5)
    assert jnp.allclose(hard_m2, jnp.mean(hard_ref2), atol=1e-5, rtol=1e-5)
    assert jnp.allclose(soft_m2, jnp.mean(soft_ref2), atol=1e-5, rtol=1e-5)

    print("KERNEL_OK")
</pallas_src>

<mosaic_0001>
module attributes {stable_mosaic.version = 11 : i64} {
  func.func @_bam_distill_kernel(%arg0: i32, %arg1: memref<8x32xf32, #tpu.memory_space<vmem>>, %arg2: memref<8x2xf32, #tpu.memory_space<vmem>>, %arg3: memref<8x32xf32, #tpu.memory_space<vmem>>, %arg4: memref<1x8x128xf32, #tpu.memory_space<vmem>>) attributes {dimension_semantics = [#tpu.dimension_semantics<parallel>], iteration_bounds = array<i64: 1>, scalar_prefetch = 0 : i64, scratch_operands = 0 : i64, tpu.core_type = #tpu.core_type<tc>, window_params = [{transform_indices = @transform_0, window_bounds = array<i64: 8, 32>}, {transform_indices = @transform_1, window_bounds = array<i64: 8, 2>}, {transform_indices = @transform_2, window_bounds = array<i64: 8, 32>}, {transform_indices = @transform_3, window_bounds = array<i64: 1, 8, 128>}]} {
    %c0 = arith.constant 0 : index
    %c0_0 = arith.constant 0 : index
    %0 = vector.load %arg1[%c0, %c0_0] : memref<8x32xf32, #tpu.memory_space<vmem>>, vector<8x32xf32>
    %cst = arith.constant dense<0xFF800000> : vector<8xf32>
    %1 = vector.multi_reduction <maximumf>, %0, %cst [1] : vector<8x32xf32> to vector<8xf32>
    %2 = vector.shape_cast %1 : vector<8xf32> to vector<8x1xf32>
    %3 = vector.broadcast %2 : vector<8x1xf32> to vector<8x32xf32>
    %4 = arith.subf %0, %3 : vector<8x32xf32>
    %5 = math.exp %4 : vector<8x32xf32>
    %cst_1 = arith.constant dense<0.000000e+00> : vector<8xf32>
    %6 = vector.multi_reduction <add>, %5, %cst_1 [1] : vector<8x32xf32> to vector<8xf32>
    %7 = vector.shape_cast %6 : vector<8xf32> to vector<8x1xf32>
    %8 = math.log %7 : vector<8x1xf32>
    %c8_i32 = arith.constant 8 : i32
    %9 = arith.muli %arg0, %c8_i32 : i32
    %10 = tpu.iota {dimensions = array<i32: 0>} : vector<8x1xi32>
    %11 = vector.broadcast %9 : i32 to vector<8x1xi32>
    %12 = arith.addi %11, %10 : vector<8x1xi32>
    %c8_i32_2 = arith.constant 8 : i32
    %13 = vector.broadcast %c8_i32_2 : i32 to vector<8x1xi32>
    %14 = arith.cmpi slt, %12, %13 : vector<8x1xi32>
    %15 = tpu.iota {dimensions = array<i32: 1>} : vector<8x32xi32>
    %c0_3 = arith.constant 0 : index
    %c0_4 = arith.constant 0 : index
    %16 = vector.load %arg2[%c0_3, %c0_4] : memref<8x2xf32, #tpu.memory_space<vmem>>, vector<8x2xf32>
    %17 = vector.extract_strided_slice %16 {offsets = [0, 0], sizes = [8, 1], strides = [1, 1]} : vector<8x2xf32> to vector<8x1xf32>
    %18 = arith.fptosi %17 : vector<8x1xf32> to vector<8x1xi32>
    %19 = vector.broadcast %18 : vector<8x1xi32> to vector<8x32xi32>
    %20 = arith.cmpi eq, %15, %19 : vector<8x32xi32>
    %cst_5 = arith.constant 0.000000e+00 : f32
    %21 = vector.broadcast %cst_5 : f32 to vector<8x32xf32>
    %22 = arith.select %20, %4, %21 : vector<8x32xi1>, vector<8x32xf32>
    %cst_6 = arith.constant dense<0.000000e+00> : vector<8xf32>
    %23 = vector.multi_reduction <add>, %22, %cst_6 [1] : vector<8x32xf32> to vector<8xf32>
    %24 = vector.shape_cast %23 : vector<8xf32> to vector<8x1xf32>
    %25 = arith.subf %8, %24 : vector<8x1xf32>
    %cst_7 = arith.constant 0.000000e+00 : f32
    %26 = vector.broadcast %cst_7 : f32 to vector<8x1xf32>
    %27 = arith.select %14, %25, %26 : vector<8x1xi1>, vector<8x1xf32>
    %c0_8 = arith.constant 0 : index
    %c0_9 = arith.constant 0 : index
    %28 = vector.load %arg3[%c0_8, %c0_9] : memref<8x32xf32, #tpu.memory_space<vmem>>, vector<8x32xf32>
    %cst_10 = arith.constant dense<0.000000e+00> : vector<8xf32>
    %29 = vector.multi_reduction <add>, %28, %cst_10 [1] : vector<8x32xf32> to vector<8xf32>
    %30 = vector.shape_cast %29 : vector<8xf32> to vector<8x1xf32>
    %31 = arith.mulf %30, %8 : vector<8x1xf32>
    %32 = arith.mulf %28, %4 : vector<8x32xf32>
    %cst_11 = arith.constant dense<0.000000e+00> : vector<8xf32>
    %33 = vector.multi_reduction <add>, %32, %cst_11 [1] : vector<8x32xf32> to vector<8xf32>
    %34 = vector.shape_cast %33 : vector<8xf32> to vector<8x1xf32>
    %35 = arith.subf %31, %34 : vector<8x1xf32>
    %cst_12 = arith.constant 0.000000e+00 : f32
    %36 = vector.broadcast %cst_12 : f32 to vector<8x1xf32>
    %37 = arith.select %14, %35, %36 : vector<8x1xi1>, vector<8x1xf32>
    %38 = vector.extract_strided_slice %16 {offsets = [0, 1], sizes = [8, 1], strides = [1, 1]} : vector<8x2xf32> to vector<8x1xf32>
    %cst_13 = arith.constant 0.000000e+00 : f32
    %39 = vector.broadcast %cst_13 : f32 to vector<8x1xf32>
    %40 = arith.select %14, %38, %39 : vector<8x1xi1>, vector<8x1xf32>
    %41 = vector.shape_cast %27 : vector<8x1xf32> to vector<1x8x1xf32>
    %cst_14 = arith.constant dense<0.000000e+00> : vector<1xf32>
    %42 = vector.multi_reduction <add>, %41, %cst_14 [1, 2] : vector<1x8x1xf32> to vector<1xf32>
    %43 = vector.shape_cast %42 : vector<1xf32> to vector<1x1x1xf32>
    %44 = vector.extract %43[0, 0, 0] : f32 from vector<1x1x1xf32>
    %45 = vector.shape_cast %37 : vector<8x1xf32> to vector<1x8x1xf32>
    %cst_15 = arith.constant dense<0.000000e+00> : vector<1xf32>
    %46 = vector.multi_reduction <add>, %45, %cst_15 [1, 2] : vector<1x8x1xf32> to vector<1xf32>
    %47 = vector.shape_cast %46 : vector<1xf32> to vector<1x1x1xf32>
    %48 = vector.extract %47[0, 0, 0] : f32 from vector<1x1x1xf32>
    %49 = arith.mulf %27, %40 : vector<8x1xf32>
    %50 = vector.shape_cast %49 : vector<8x1xf32> to vector<1x8x1xf32>
    %cst_16 = arith.constant dense<0.000000e+00> : vector<1xf32>
    %51 = vector.multi_reduction <add>, %50, %cst_16 [1, 2] : vector<1x8x1xf32> to vector<1xf32>
    %52 = vector.shape_cast %51 : vector<1xf32> to vector<1x1x1xf32>
    %53 = vector.extract %52[0, 0, 0] : f32 from vector<1x1x1xf32>
    %54 = arith.mulf %37, %40 : vector<8x1xf32>
    %55 = vector.shape_cast %54 : vector<8x1xf32> to vector<1x8x1xf32>
    %cst_17 = arith.constant dense<0.000000e+00> : vector<1xf32>
    %56 = vector.multi_reduction <add>, %55, %cst_17 [1, 2] : vector<1x8x1xf32> to vector<1xf32>
    %57 = vector.shape_cast %56 : vector<1xf32> to vector<1x1x1xf32>
    %58 = vector.extract %57[0, 0, 0] : f32 from vector<1x1x1xf32>
    %59 = tpu.iota {dimensions = array<i32: 2>} : vector<1x8x128xi32>
    %c0_i32 = arith.constant 0 : i32
    %60 = vector.broadcast %c0_i32 : i32 to vector<1x8x128xi32>
    %61 = arith.cmpi eq, %59, %60 : vector<1x8x128xi32>
    %c1_i32 = arith.constant 1 : i32
    %62 = vector.broadcast %c1_i32 : i32 to vector<1x8x128xi32>
    %63 = arith.cmpi eq, %59, %62 : vector<1x8x128xi32>
    %c2_i32 = arith.constant 2 : i32
    %64 = vector.broadcast %c2_i32 : i32 to vector<1x8x128xi32>
    %65 = arith.cmpi eq, %59, %64 : vector<1x8x128xi32>
    %c3_i32 = arith.constant 3 : i32
    %66 = vector.broadcast %c3_i32 : i32 to vector<1x8x128xi32>
    %67 = arith.cmpi eq, %59, %66 : vector<1x8x128xi32>
    %cst_18 = arith.constant 0.000000e+00 : f32
    %68 = vector.broadcast %58 : f32 to vector<1x8x128xf32>
    %69 = vector.broadcast %cst_18 : f32 to vector<1x8x128xf32>
    %70 = arith.select %67, %68, %69 : vector<1x8x128xi1>, vector<1x8x128xf32>
    %71 = vector.broadcast %53 : f32 to vector<1x8x128xf32>
    %72 = arith.select %65, %71, %70 : vector<1x8x128xi1>, vector<1x8x128xf32>
    %73 = vector.broadcast %48 : f32 to vector<1x8x128xf32>
    %74 = arith.select %63, %73, %72 : vector<1x8x128xi1>, vector<1x8x128xf32>
    %75 = vector.broadcast %44 : f32 to vector<1x8x128xf32>
    %76 = arith.select %61, %75, %74 : vector<1x8x128xi1>, vector<1x8x128xf32>
    %c0_19 = arith.constant 0 : index
    %c0_20 = arith.constant 0 : index
    %c0_21 = arith.constant 0 : index
    %77 = vector.load %arg4[%c0_19, %c0_20, %c0_21] : memref<1x8x128xf32, #tpu.memory_space<vmem>>, vector<1x8x128xf32>
    tpu.vector_store %arg4[%c0_19, %c0_20, %c0_21], %76 {strides = array<i32>} : memref<1x8x128xf32, #tpu.memory_space<vmem>>, vector<1x8x128xf32>,
    return
  }
  func.func @transform_0(%arg0: i32) -> (i32, i32) {
    %c0_i32 = arith.constant 0 : i32
    %c0_i32_0 = arith.constant 0 : i32
    return %arg0, %c0_i32 : i32, i32
  }
  func.func @transform_1(%arg0: i32) -> (i32, i32) {
    %c0_i32 = arith.constant 0 : i32
    %c0_i32_0 = arith.constant 0 : i32
    return %arg0, %c0_i32 : i32, i32
  }
  func.func @transform_2(%arg0: i32) -> (i32, i32) {
    %c0_i32 = arith.constant 0 : i32
    %c0_i32_0 = arith.constant 0 : i32
    return %arg0, %c0_i32 : i32, i32
  }
  func.func @transform_3(%arg0: i32) -> (i32, i32, i32) {
    %c0_i32 = arith.constant 0 : i32
    %c0_i32_0 = arith.constant 0 : i32
    %c0_i32_1 = arith.constant 0 : i32
    return %arg0, %c0_i32, %c0_i32_0 : i32, i32, i32
  }
}

</mosaic_0001>

<bundles_post_ra>
// kernel: tpu_custom_call.1
= control target key start
LH: loop header
LB: loop body
LE: loop exit
PB: predicated region body
PF: predicated region fallthrough
CT: control target
= control target key end

     0   :  { %8 = vsyncpa [#allocation3], 0  ;;  %s376_s0 = inlined_call_operand.hbm [shape: f32[8,32], index: 0, kind: input, shape index: {}]   ;;  %s377_s1 = inlined_call_operand.hbm [shape: f32[8,2], index: 1, kind: input, shape index: {}]   ;;  %s378_s2 = inlined_call_operand.hbm [shape: f32[8,32], index: 2, kind: input, shape index: {}]   ;;  %s379_s3 = inlined_call_operand.hbm [shape: f32[1,8,128], index: 3, kind: output, shape index: {}]  }
   0x1   :  { %9 = vsyncpa [#allocation6], 0 }
   0x2   :  { %10 = vsyncpa [#allocation4], 0  ;;  %s290_s12 = smov [#allocation5]   ;;  %s291_s14 = smov [#allocation2]  }
   0x3   :  { %s27_s13 = sshll.u32 %s290_s12, 4  ;;  %s17_s15 = sshll.u32 %s291_s14, 4  ;;  %s28_s13 = int_to_ptr.vmem [resolvable:$true] %s27_s13  ;;  %s18_s15 = int_to_ptr.vmem [resolvable:$true] %s17_s15 }
   0x4   :  { %s196_s18 = scalar_lea.hbm %s377_s1, 128 }
   0x5   :  { %p197_p0 = scmp.ne.s32.totalorder %s377_s1, %s196_s18  ;;  %p200_p1 = scmp.lt.u32.totalorder %s196_s18, %s377_s1 }
   0x7   :  { %p202_p2 = pnand %p200_p1, %p197_p0 }
   0x9   :  { %205 = shalt.err (!%p202_p2)
}
   0xa   :  { %s206_s23 = scalar_lea.vmem %s28_s13, 128  ;;  %p211_p4 = scmp.lt.s32.totalorder %s28_s13, %s28_s13 }
   0xb   :  { %p207_p3 = scmp.ne.s32.totalorder %s28_s13, %s206_s23  ;;  %p212_p5 = scmp.lt.s32.totalorder %s206_s23, %s206_s23 }
   0xd   :  { %p213_p6 = por %p212_p5, %p211_p4 }
   0xf   :  { %p214_p7 = pnand %p213_p6, %p207_p3 }
  0x11   :  { %217 = shalt.err (!%p214_p7)
}
  0x12   :  { %30 = dma.hbm_to_vmem [thread:$0]  %s377_s1, 128, %s28_s13, [#allocation6]  }
  0x13   :  { %s218_s28 = scalar_lea.hbm %s376_s0, 128 }
  0x14   :  { %p219_p8 = scmp.ne.s32.totalorder %s376_s0, %s218_s28  ;;  %p222_p9 = scmp.lt.u32.totalorder %s218_s28, %s376_s0 }
  0x16   :  { %p224_p10 = pnand %p222_p9, %p219_p8 }
  0x18   :  { %227 = shalt.err (!%p224_p10)
}
  0x19   :  { %s228_s6 = scalar_lea.vmem %s18_s15, 128  ;;  %p233_p12 = scmp.lt.s32.totalorder %s18_s15, %s18_s15 }
  0x1a   :  { %p229_p11 = scmp.ne.s32.totalorder %s18_s15, %s228_s6  ;;  %p234_p13 = scmp.lt.s32.totalorder %s228_s6, %s228_s6 }
  0x1c   :  { %p235_p0 = por %p234_p13, %p233_p12 }
  0x1e   :  { %p236_p1 = pnand %p235_p0, %p229_p11 }
  0x20   :  { %239 = shalt.err (!%p236_p1)
}
  0x21   :  { %20 = dma.hbm_to_vmem [thread:$0]  %s376_s0, 128, %s18_s15, [#allocation3]  }
  0x22   :  { %s292_s8 = smov [#allocation7]   ;;  %s240_s12 = scalar_lea.hbm %s378_s2, 128 }
  0x23   :  { %s37_s9 = sshll.u32 %s292_s8, 4  ;;  %p241_p2 = scmp.ne.s32.totalorder %s378_s2, %s240_s12  ;;  %s38_s9 = int_to_ptr.vmem [resolvable:$true] %s37_s9 }
  0x24   :  { %p244_p3 = scmp.lt.u32.totalorder %s240_s12, %s378_s2 }
  0x26   :  { %p246_p4 = pnand %p244_p3, %p241_p2 }
  0x28   :  { %249 = shalt.err (!%p246_p4)
}
  0x29   :  { %s250_s18 = scalar_lea.vmem %s38_s9, 128  ;;  %p255_p6 = scmp.lt.s32.totalorder %s38_s9, %s38_s9 }
  0x2a   :  { %p251_p5 = scmp.ne.s32.totalorder %s38_s9, %s250_s18  ;;  %p256_p7 = scmp.lt.s32.totalorder %s250_s18, %s250_s18 }
  0x2c   :  { %p257_p8 = por %p256_p7, %p255_p6 }
  0x2e   :  { %p258_p9 = pnand %p257_p8, %p251_p5 }
  0x30   :  { %261 = shalt.err (!%p258_p9)
}
  0x31   :  { %40 = dma.hbm_to_vmem [thread:$0]  %s378_s2, 128, %s38_s9, [#allocation6]  }
  0x32   :  { %284 = dma.done.wait [#allocation3], 128  }
  0x33   :  { %285 = vsyncadd [#allocation3], 4294967168 }
  0x34   :  { %286 = dma.done.wait [#allocation6], 256  }
  0x35   :  { %287 = vsyncadd [#allocation6], 4294967040  ;;  %v293_v0 = vmov 0   ;;  %vm51_vm0 = vcmask 261120   ;;  %v50_v1 = vld [vmem:[#allocation2] sm:$0xff]  ;;  %v71_v3 = vld [vmem:[#allocation5] sm:$0xff]  ;;  %v69_v9 = vlaneseq }
  0x36   :  { %191 = vset.pattern.permute.xlu0 %v293_v0  ;;  %v52_v2 = vsel %vm51_vm0, %v50_v1, -inf  ;;  %v175_v4 = vtrunc.f32 %v71_v3  ;;  %v83_v14 = vld [vmem:[#allocation7] sm:$0xff]  ;;  %vm95_vm2 = vcmask 7168   ;;  %s294_s2 = smov 127   ;;  %s295_s23 = smov [#allocation8]  }
  0x37   :  { %53 = vmax.xlane.f32.xlu0 %v52_v2  ;;  %v353_v10 = vand.u32 127, %v69_v9  ;;  %v84_v15 = vsel %vm51_vm0, %v83_v14, 0.0  ;;  %s165_s24 = sshll.u32 %s295_s23, 4  ;;  %s166_s24 = int_to_ptr.vmem [resolvable:$true] %s165_s24 }
  0x38   :  { %v176_v5 = vcvt.f32.s32 %v175_v4  ;;  %s262_s25 = scalar_lea.vmem %s166_s24, 128  ;;  %p267_p11 = scmp.lt.s32.totalorder %s166_s24, %s166_s24 }
  0x39   :  { %vm149_vm3 = vcmp.eq.s32.totalorder %v353_v10, 3  ;;  %vm148_vm4 = vcmp.eq.s32.totalorder %v353_v10, 2  ;;  %vm147_vm5 = vcmp.eq.s32.totalorder %v353_v10, 1  ;;  %vm146_vm6 = vcmp.eq.s32.totalorder %v353_v10, 0  ;;  %p263_p10 = scmp.ne.s32.totalorder %s166_s24, %s262_s25  ;;  %p268_p12 = scmp.lt.s32.totalorder %s262_s25, %s262_s25 }
  0x3b   :  { %p269_p13 = por %p268_p12, %p267_p11 }
  0x3d   :  { %p270_p0 = pnand %p269_p13, %p263_p10 }
  0x4d   :  { %74 = vperm.xlu0 %191, %v176_v5  }
  0xc4   :  { %v54_v6 = vpop.xlane.xlu0 %53 }
  0xc5   :  { %v55_v7 = vsub.f32 %v50_v1, %v54_v6 }
  0xc7   :  { %v56_v8 = vmul.f32 1.442695, %v55_v7  ;;  %v88_v18 = vmul.f32 %v83_v14, %v55_v7 }
  0xc9   :  { %192 = vpow2.f32 %v56_v8  ;;  %v89_v19 = vsel %vm51_vm0, %v88_v18, 0.0 }
  0xcc   :  { %v75_v12 = vpop.permute.xlu0 %74 }
  0xcd   :  { %vm76_vm1 = vcmp.eq.s32.totalorder %v353_v10, %v75_v12 }
  0xce   :  { %v77_v16 = vsel %vm76_vm1, %v55_v7, 0.0 }
  0xcf   :  { %v78_v17 = vsel %vm51_vm0, %v77_v16, 0.0 }
  0xd3   :  { %v193_v11 = vpop.eup %192 }
  0xd4   :  { %v58_v13 = vsel %vm51_vm0, %v193_v11, 0.0 }
  0xd5   :  { %59 = vadd.xlane.f32.xlu1 %v58_v13 }
  0xd9   :  { %85 = vadd.xlane.f32.xlu1 %v84_v15 }
  0xdd   :  { %79 = vadd.xlane.f32.xlu1 %v78_v17 }
  0xe1   :  { %90 = vadd.xlane.f32.xlu1 %v89_v19 }
 0x162   :  { %v60_v20 = vpop.xlane.xlu1 %59 }
 0x163   :  { %194 = vlog2.f32 %v60_v20 }
 0x166   :  { %v86_v21 = vpop.xlane.xlu1 %85 }
 0x16a   :  { %v80_v22 = vpop.xlane.xlu1 %79 }
 0x16d   :  { %v195_v23 = vpop.eup %194 }
 0x16e   :  { %v62_v24 = vmul.f32 0.6931472, %v195_v23  ;;  %v91_v27 = vpop.xlane.xlu1 %90 }
 0x170   :  { %v87_v25 = vmul.f32 %v86_v21, %v62_v24  ;;  %v81_v26 = vsub.f32 %v62_v24, %v80_v22 }
 0x172   :  { %v116_v28 = vmul.f32 %v81_v26, %v71_v3  ;;  %v92_v29 = vsub.f32 %v87_v25, %v91_v27  ;;  %v96_v32 = vsel %vm95_vm2, %v81_v26, 0.0 }
 0x174   :  { %118 = vrot.lane.b32.xlu1 %v116_v28, %s294_s2  ;;  %v106_v30 = vsel %vm95_vm2, %v92_v29, 0.0  ;;  %v131_v31 = vmul.f32 %v92_v29, %v71_v3 }
 0x175   :  { %107 = vadd.xlane.f32.xlu0 %v106_v30 }
 0x178   :  { %133 = vrot.lane.b32.xlu1 %v131_v31, %s294_s2 }
 0x19c   :  { %97 = vadd.xlane.f32.xlu1 %v96_v32 }
 0x1e6   :  { %v119_v33 = vpop.permute.xlu1 %118 }
 0x1e7   :  { %v121_v34 = vsel %vm95_vm2, %v119_v33, 0.0 }
 0x1e8   :  { %122 = vadd.xlane.f32.xlu1 %v121_v34 }
 0x1ea   :  { %v134_v35 = vpop.permute.xlu1 %133 }
 0x1eb   :  { %v136_v36 = vsel %vm95_vm2, %v134_v35, 0.0 }
 0x1ec   :  { %137 = vadd.xlane.f32.xlu1 %v136_v36 }
 0x202   :  { %v108_v37 = vpop.xlane.xlu0 %107 }
 0x203   :  { %v109_v38 = vrot.slane %v108_v37, 4 }
 0x205   :  { %v110_v39 = vadd.f32 %v109_v38, %v108_v37 }
 0x207   :  { %v111_v40 = vrot.slane %v110_v39, 2 }
 0x209   :  { %v112_v44 = vadd.f32 %v111_v40, %v110_v39 }
 0x20b   :  { %v113_v47 = vrot.slane %v112_v44, 1 }
 0x20d   :  { %v114_v50 = vadd.f32 %v113_v47, %v112_v44 }
 0x229   :  { %v98_v41 = vpop.xlane.xlu1 %97 }
 0x22a   :  { %v99_v42 = vrot.slane %v98_v41, 4 }
 0x22c   :  { %v100_v43 = vadd.f32 %v99_v42, %v98_v41 }
 0x22e   :  { %v101_v45 = vrot.slane %v100_v43, 2 }
 0x230   :  { %v102_v46 = vadd.f32 %v101_v45, %v100_v43 }
 0x232   :  { %v103_v48 = vrot.slane %v102_v46, 1 }
 0x234   :  { %v104_v49 = vadd.f32 %v103_v48, %v102_v46 }
 0x236   :  { %177 = vpush %v104_v49 }
 0x237   :  { %179 = vpush %v114_v50 }
 0x267   :  { %s178_s19 = spop %177 }
 0x268   :  { %s180_s20 = spop %179  ;;  %v156_v6 = vstv %s178_s19 }
 0x269   :  { %v154_v4 = vstv %s180_s20 }
 0x275   :  { %v123_v51 = vpop.xlane.xlu1 %122 }
 0x276   :  { %v124_v52 = vrot.slane %v123_v51, 4 }
 0x278   :  { %v125_v53 = vadd.f32 %v124_v52, %v123_v51 }
 0x279   :  { %v138_v54 = vpop.xlane.xlu1 %137 }
 0x27a   :  { %v126_v55 = vrot.slane %v125_v53, 2  ;;  %v139_v56 = vrot.slane %v138_v54, 4 }
 0x27c   :  { %v140_v57 = vadd.f32 %v139_v56, %v138_v54  ;;  %v127_v58 = vadd.f32 %v126_v55, %v125_v53 }
 0x27e   :  { %v141_v59 = vrot.slane %v140_v57, 2  ;;  %v128_v60 = vrot.slane %v127_v58, 1 }
 0x280   :  { %v142_v61 = vadd.f32 %v141_v59, %v140_v57  ;;  %v129_v62 = vadd.f32 %v128_v60, %v127_v58 }
 0x282   :  { %181 = vpush %v129_v62  ;;  %v143_v63 = vrot.slane %v142_v61, 1 }
 0x284   :  { %v144_v0 = vadd.f32 %v143_v63, %v142_v61 }
 0x286   :  { %183 = vpush %v144_v0 }
 0x2b3   :  { %s182_s21 = spop %181 }
 0x2b4   :  { %v152_v2 = vstv %s182_s21 }
 0x2b7   :  { %s184_s22 = spop %183 }
 0x2b8   :  { %v150_v1 = vstv %s184_s22 }
 0x2b9   :  { %v151_v3 = vsel %vm149_vm3, %v150_v1, 0.0 }
 0x2ba   :  { %v153_v5 = vsel %vm148_vm4, %v152_v2, %v151_v3 }
 0x2bb   :  { %v155_v7 = vsel %vm147_vm5, %v154_v4, %v153_v5 }
 0x2bc   :  { %v157_v8 = vsel %vm146_vm6, %v156_v6, %v155_v7 }
 0x2bd   :  { %158 = vst [vmem:[#allocation8] sm:$0xff] %v157_v8 }
 0x2be   :  { %273 = shalt.err (!%p270_p0)
}
 0x2bf   :  { %s274_s28 = scalar_lea.hbm %s379_s3, 128 }
 0x2c0   :  { %p275_p1 = scmp.ne.s32.totalorder %s379_s3, %s274_s28  ;;  %p278_p2 = scmp.lt.u32.totalorder %s274_s28, %s379_s3 }
 0x2c2   :  { %p280_p3 = pnand %p278_p2, %p275_p1 }
 0x2c4   :  { %283 = shalt.err (!%p280_p3)
}
 0x2c5   :  { %168 = dma.vmem_to_hbm [thread:$0]  %s166_s24, 128, %s379_s3, [#allocation4]  }
 0x2c6   :  { %288 = dma.done.wait [#allocation4], 128  }
 0x2c7   :  { %289 = vsyncadd [#allocation4], 4294967168 }
 0x2c8   :  { %172 = vsyncpa [#allocation3], 1 }
 0x2c9   :  { %173 = vsyncpa [#allocation6], 1 }
 0x2ca   :  { %174 = vsyncpa [#allocation4], 1 }

</bundles_post_ra>
